<compile_context>
chip_gen: v6e
topology: v6e:2x2x1
jax: 0.10.0
libtpu: 0.0.40
codegen_flags: <defaults>
</compile_context>

<pallas_src>
import functools

import jax
import jax.numpy as jnp
from jax import lax
from jax.experimental import pallas as pl
from jax.experimental.pallas import tpu as pltpu


def _pick_spatial_tile(B, C, S, dtype_bytes=4, vmem_budget=16 << 20):
    """Largest 128-multiple divisor of S whose double-buffered in+out tiles
    fit the VMEM budget of the scale kernel (4 live x-sized tiles)."""
    if S % 128 != 0:
        # Fall back to a full-axis block (always a legal BlockSpec shape).
        return S
    max_ts = max(128, vmem_budget // (4 * B * C * dtype_bytes))
    k = S // 128
    best = 128
    for d in range(1, k + 1):
        if k % d == 0:
            ts = d * 128
            if ts <= max_ts:
                best = ts
    return best


def _squeeze_excite_kernel(x_ref, w1_ref, b1_ref, w2_ref, b2_ref,
                           gate_ref, acc_ref, *, inv_s):
    t = pl.program_id(0)

    @pl.when(t == 0)
    def _init():
        acc_ref[...] = jnp.zeros_like(acc_ref)
        gate_ref[...] = jnp.zeros_like(gate_ref)

    # Partial spatial sum for this tile: (B, C, TS) -> (B, C), f32 accumulate.
    acc_ref[...] += jnp.sum(x_ref[...].astype(jnp.float32), axis=-1)

    @pl.when(t == pl.num_programs(0) - 1)
    def _finalize():
        mean = acc_ref[...] * inv_s                               # (B, C)
        h = jnp.dot(mean, w1_ref[...],
                    preferred_element_type=jnp.float32,
                    precision=lax.Precision.HIGHEST) + b1_ref[...]
        h = jnp.maximum(h, 0.0)                                   # (B, Hd)
        g = jnp.dot(h, w2_ref[...],
                    preferred_element_type=jnp.float32,
                    precision=lax.Precision.HIGHEST) + b2_ref[...]
        gate_ref[...] = 1.0 / (1.0 + jnp.exp(-g))                 # sigmoid, (B, C)


def _scale_kernel(x_ref, gate_ref, o_ref):
    # (B, C, TS) * (B, C, 1): lane-broadcast multiply, lane-dense stores.
    x = x_ref[...].astype(jnp.float32)
    g = gate_ref[...][:, :, None]
    o_ref[...] = (x * g).astype(o_ref.dtype)


def se_block_3d(x, w1, b1, w2, b2):
    """SEBlock3D forward.

    x: (B, C, T, H, W); w1: (Hd, C); b1: (Hd,); w2: (C, Hd); b2: (C,).
    """
    B, C, T, H, W = x.shape
    Hd = w1.shape[0]
    S = T * H * W
    TS = _pick_spatial_tile(B, C, S, dtype_bytes=x.dtype.itemsize)
    n_tiles = S // TS

    x3 = x.reshape(B, C, S)                       # free reshape, spatial on lanes
    w1_t = w1.T.astype(jnp.float32)               # (C, Hd)
    w2_t = w2.T.astype(jnp.float32)               # (Hd, C)
    b1_2 = b1.reshape(1, Hd).astype(jnp.float32)
    b2_2 = b2.reshape(1, C).astype(jnp.float32)

    # ---- kernel 1: squeeze (tiled spatial mean) + excitation (FC-ReLU-FC-sigmoid)
    gate = pl.pallas_call(
        functools.partial(_squeeze_excite_kernel, inv_s=1.0 / S),
        out_shape=jax.ShapeDtypeStruct((B, C), jnp.float32),
        grid=(n_tiles,),
        in_specs=[
            pl.BlockSpec((B, C, TS), lambda t: (0, 0, t)),   # x spatial tile
            pl.BlockSpec((C, Hd), lambda t: (0, 0)),         # fc1 weight^T
            pl.BlockSpec((1, Hd), lambda t: (0, 0)),         # fc1 bias
            pl.BlockSpec((Hd, C), lambda t: (0, 0)),         # fc2 weight^T
            pl.BlockSpec((1, C), lambda t: (0, 0)),          # fc2 bias
        ],
        out_specs=pl.BlockSpec((B, C), lambda t: (0, 0)),
        scratch_shapes=[pltpu.VMEM((B, C), jnp.float32)],
        compiler_params=pltpu.CompilerParams(
            dimension_semantics=("arbitrary",)),
        cost_estimate=pl.CostEstimate(
            flops=B * C * S + 4 * B * C * Hd,
            transcendentals=B * C,
            bytes_accessed=x.dtype.itemsize * B * C * S
            + 4 * (2 * C * Hd + Hd + C + B * C)),
    )(x3, w1_t, b1_2, w2_t, b2_2)

    # ---- kernel 2: channel-wise rescale, lane-dense loads/stores ----
    out3 = pl.pallas_call(
        _scale_kernel,
        out_shape=jax.ShapeDtypeStruct((B, C, S), x.dtype),
        grid=(n_tiles,),
        in_specs=[
            pl.BlockSpec((B, C, TS), lambda t: (0, 0, t)),
            pl.BlockSpec((B, C), lambda t: (0, 0)),
        ],
        out_specs=pl.BlockSpec((B, C, TS), lambda t: (0, 0, t)),
        compiler_params=pltpu.CompilerParams(
            dimension_semantics=("parallel",)),
        cost_estimate=pl.CostEstimate(
            flops=B * C * S,
            transcendentals=0,
            bytes_accessed=2 * x.dtype.itemsize * B * C * S + 4 * B * C),
    )(x3, gate)

    return out3.reshape(B, C, T, H, W)


def reference(x, w1, b1, w2, b2):
    """Pure-JAX reference matching the PyTorch SEBlock3D forward."""
    y = jnp.mean(x, axis=(2, 3, 4))                                      # (B, C)
    y = jnp.maximum(
        jnp.dot(y, w1.T, precision=lax.Precision.HIGHEST) + b1, 0.0)
    y = jax.nn.sigmoid(
        jnp.dot(y, w2.T, precision=lax.Precision.HIGHEST) + b2)
    return x * y[:, :, None, None, None]


if __name__ == "__main__":
    # channels must be >= reduction for nn.Linear(channels, channels // reduction)
    B, C, T, H, W = 2, 32, 8, 16, 16
    reduction = 16
    Hd = C // reduction

    key = jax.random.PRNGKey(0)
    k_x, k_w1, k_b1, k_w2, k_b2 = jax.random.split(key, 5)

    x = jax.random.normal(k_x, (B, C, T, H, W), dtype=jnp.float32)

    # nn.Linear default init: U(-1/sqrt(fan_in), 1/sqrt(fan_in))
    bnd1 = 1.0 / (C ** 0.5)
    w1 = jax.random.uniform(k_w1, (Hd, C), jnp.float32, -bnd1, bnd1)
    b1 = jax.random.uniform(k_b1, (Hd,), jnp.float32, -bnd1, bnd1)
    bnd2 = 1.0 / (Hd ** 0.5)
    w2 = jax.random.uniform(k_w2, (C, Hd), jnp.float32, -bnd2, bnd2)
    b2 = jax.random.uniform(k_b2, (C,), jnp.float32, -bnd2, bnd2)

    out = se_block_3d(x, w1, b1, w2, b2)
    out = jax.block_until_ready(out)

    ref = reference(x, w1, b1, w2, b2)
    assert out.shape == (B, C, T, H, W), out.shape
    max_err = float(jnp.max(jnp.abs(out - ref)))
    assert jnp.allclose(out, ref, atol=1e-4, rtol=1e-4), max_err

    print("KERNEL_OK")
</pallas_src>

<mosaic_0001>
module attributes {stable_mosaic.version = 11 : i64} {
  func.func @_squeeze_excite_kernel(%arg0: i32, %arg1: memref<2x32x2048xf32, #tpu.memory_space<vmem>>, %arg2: memref<32x2xf32, #tpu.memory_space<vmem>>, %arg3: memref<1x2xf32, #tpu.memory_space<vmem>>, %arg4: memref<2x32xf32, #tpu.memory_space<vmem>>, %arg5: memref<1x32xf32, #tpu.memory_space<vmem>>, %arg6: memref<2x32xf32, #tpu.memory_space<vmem>>, %arg7: memref<2x32xf32, #tpu.memory_space<vmem>>) attributes {dimension_semantics = [#tpu.dimension_semantics<arbitrary>], iteration_bounds = array<i64: 1>, scalar_prefetch = 0 : i64, scratch_operands = 1 : i64, tpu.core_type = #tpu.core_type<tc>, window_params = [{transform_indices = @transform_0, window_bounds = array<i64: 2, 32, 2048>}, {pipeline_mode = #tpu.pipeline_mode<synchronous>, transform_indices = @transform_1, window_bounds = array<i64: 32, 2>}, {pipeline_mode = #tpu.pipeline_mode<synchronous>, transform_indices = @transform_2, window_bounds = array<i64: 1, 2>}, {pipeline_mode = #tpu.pipeline_mode<synchronous>, transform_indices = @transform_3, window_bounds = array<i64: 2, 32>}, {pipeline_mode = #tpu.pipeline_mode<synchronous>, transform_indices = @transform_4, window_bounds = array<i64: 1, 32>}, {pipeline_mode = #tpu.pipeline_mode<synchronous>, transform_indices = @transform_5, window_bounds = array<i64: 2, 32>}]} {
    %c0_i32 = arith.constant 0 : i32
    %0 = arith.cmpi eq, %arg0, %c0_i32 : i32
    %1 = arith.extui %0 : i1 to i32
    %c0_i32_0 = arith.constant 0 : i32
    %2 = arith.cmpi ne, %1, %c0_i32_0 : i32
    scf.if %2 {
      %cst_9 = arith.constant 0.000000e+00 : f32
      %11 = vector.broadcast %cst_9 : f32 to vector<2x32xf32>
      %c0_10 = arith.constant 0 : index
      %c0_11 = arith.constant 0 : index
      %12 = vector.load %arg7[%c0_10, %c0_11] : memref<2x32xf32, #tpu.memory_space<vmem>>, vector<2x32xf32>
      tpu.vector_store %arg7[%c0_10, %c0_11], %11 {strides = array<i32>} : memref<2x32xf32, #tpu.memory_space<vmem>>, vector<2x32xf32>,
      %cst_12 = arith.constant 0.000000e+00 : f32
      %13 = vector.broadcast %cst_12 : f32 to vector<2x32xf32>
      %c0_13 = arith.constant 0 : index
      %c0_14 = arith.constant 0 : index
      %14 = vector.load %arg6[%c0_13, %c0_14] : memref<2x32xf32, #tpu.memory_space<vmem>>, vector<2x32xf32>
      tpu.vector_store %arg6[%c0_13, %c0_14], %13 {strides = array<i32>} : memref<2x32xf32, #tpu.memory_space<vmem>>, vector<2x32xf32>,
    } else {
    }
    %c0 = arith.constant 0 : index
    %c0_1 = arith.constant 0 : index
    %3 = vector.load %arg7[%c0, %c0_1] : memref<2x32xf32, #tpu.memory_space<vmem>>, vector<2x32xf32>
    %c0_2 = arith.constant 0 : index
    %c0_3 = arith.constant 0 : index
    %c0_4 = arith.constant 0 : index
    %4 = vector.load %arg1[%c0_2, %c0_3, %c0_4] : memref<2x32x2048xf32, #tpu.memory_space<vmem>>, vector<2x32x2048xf32>
    %cst = arith.constant dense<0.000000e+00> : vector<2x32xf32>
    %5 = vector.multi_reduction <add>, %4, %cst [2] : vector<2x32x2048xf32> to vector<2x32xf32>
    %6 = arith.addf %3, %5 : vector<2x32xf32>
    %c0_5 = arith.constant 0 : index
    %c0_6 = arith.constant 0 : index
    %7 = vector.load %arg7[%c0_5, %c0_6] : memref<2x32xf32, #tpu.memory_space<vmem>>, vector<2x32xf32>
    tpu.vector_store %arg7[%c0_5, %c0_6], %6 {strides = array<i32>} : memref<2x32xf32, #tpu.memory_space<vmem>>, vector<2x32xf32>,
    %c0_i32_7 = arith.constant 0 : i32
    %8 = arith.cmpi eq, %arg0, %c0_i32_7 : i32
    %9 = arith.extui %8 : i1 to i32
    %c0_i32_8 = arith.constant 0 : i32
    %10 = arith.cmpi ne, %9, %c0_i32_8 : i32
    scf.if %10 {
      %c0_9 = arith.constant 0 : index
      %c0_10 = arith.constant 0 : index
      %11 = vector.load %arg7[%c0_9, %c0_10] : memref<2x32xf32, #tpu.memory_space<vmem>>, vector<2x32xf32>
      %cst_11 = arith.constant 4.8828125E-4 : f32
      %12 = vector.broadcast %cst_11 : f32 to vector<2x32xf32>
      %13 = arith.mulf %11, %12 : vector<2x32xf32>
      %c0_12 = arith.constant 0 : index
      %c0_13 = arith.constant 0 : index
      %14 = vector.load %arg2[%c0_12, %c0_13] : memref<32x2xf32, #tpu.memory_space<vmem>>, vector<32x2xf32>
      %cst_14 = arith.constant dense<0.000000e+00> : vector<2x2xf32>
      %15 = tpu.matmul %13, %14, %cst_14 {dimension_numbers = #tpu.dot_dimension_numbers<[1], [0], [0], [1], [0, 0, 1, 1], [], []>, precision = #tpu.contract_precision<fp32>} : vector<2x32xf32>, vector<32x2xf32>, vector<2x2xf32> -> vector<2x2xf32>
      %c0_15 = arith.constant 0 : index
      %c0_16 = arith.constant 0 : index
      %16 = vector.load %arg3[%c0_15, %c0_16] : memref<1x2xf32, #tpu.memory_space<vmem>>, vector<1x2xf32>
      %17 = vector.broadcast %16 : vector<1x2xf32> to vector<2x2xf32>
      %18 = arith.addf %15, %17 : vector<2x2xf32>
      %cst_17 = arith.constant 0.000000e+00 : f32
      %19 = vector.broadcast %cst_17 : f32 to vector<2x2xf32>
      %20 = arith.maximumf %18, %19 : vector<2x2xf32>
      %c0_18 = arith.constant 0 : index
      %c0_19 = arith.constant 0 : index
      %21 = vector.load %arg4[%c0_18, %c0_19] : memref<2x32xf32, #tpu.memory_space<vmem>>, vector<2x32xf32>
      %cst_20 = arith.constant dense<0.000000e+00> : vector<2x32xf32>
      %22 = tpu.matmul %20, %21, %cst_20 {dimension_numbers = #tpu.dot_dimension_numbers<[1], [0], [0], [1], [0, 0, 1, 1], [], []>, precision = #tpu.contract_precision<fp32>} : vector<2x2xf32>, vector<2x32xf32>, vector<2x32xf32> -> vector<2x32xf32>
      %c0_21 = arith.constant 0 : index
      %c0_22 = arith.constant 0 : index
      %23 = vector.load %arg5[%c0_21, %c0_22] : memref<1x32xf32, #tpu.memory_space<vmem>>, vector<1x32xf32>
      %24 = vector.broadcast %23 : vector<1x32xf32> to vector<2x32xf32>
      %25 = arith.addf %22, %24 : vector<2x32xf32>
      %cst_23 = arith.constant 0.000000e+00 : f32
      %26 = vector.broadcast %cst_23 : f32 to vector<2x32xf32>
      %27 = arith.subf %26, %25 : vector<2x32xf32>
      %28 = math.exp %27 : vector<2x32xf32>
      %cst_24 = arith.constant 1.000000e+00 : f32
      %29 = vector.broadcast %cst_24 : f32 to vector<2x32xf32>
      %30 = arith.addf %29, %28 : vector<2x32xf32>
      %cst_25 = arith.constant 1.000000e+00 : f32
      %31 = vector.broadcast %cst_25 : f32 to vector<2x32xf32>
      %32 = arith.divf %31, %30 : vector<2x32xf32>
      %c0_26 = arith.constant 0 : index
      %c0_27 = arith.constant 0 : index
      %33 = vector.load %arg6[%c0_26, %c0_27] : memref<2x32xf32, #tpu.memory_space<vmem>>, vector<2x32xf32>
      tpu.vector_store %arg6[%c0_26, %c0_27], %32 {strides = array<i32>} : memref<2x32xf32, #tpu.memory_space<vmem>>, vector<2x32xf32>,
    } else {
    }
    return
  }
  func.func @transform_0(%arg0: i32) -> (i32, i32, i32) {
    %c0_i32 = arith.constant 0 : i32
    %c0_i32_0 = arith.constant 0 : i32
    %c0_i32_1 = arith.constant 0 : i32
    return %c0_i32, %c0_i32_0, %arg0 : i32, i32, i32
  }
  func.func @transform_1(%arg0: i32) -> (i32, i32) {
    %c0_i32 = arith.constant 0 : i32
    %c0_i32_0 = arith.constant 0 : i32
    %c0_i32_1 = arith.constant 0 : i32
    return %c0_i32, %c0_i32_0 : i32, i32
  }
  func.func @transform_2(%arg0: i32) -> (i32, i32) {
    %c0_i32 = arith.constant 0 : i32
    %c0_i32_0 = arith.constant 0 : i32
    %c0_i32_1 = arith.constant 0 : i32
    return %c0_i32, %c0_i32_0 : i32, i32
  }
  func.func @transform_3(%arg0: i32) -> (i32, i32) {
    %c0_i32 = arith.constant 0 : i32
    %c0_i32_0 = arith.constant 0 : i32
    %c0_i32_1 = arith.constant 0 : i32
    return %c0_i32, %c0_i32_0 : i32, i32
  }
  func.func @transform_4(%arg0: i32) -> (i32, i32) {
    %c0_i32 = arith.constant 0 : i32
    %c0_i32_0 = arith.constant 0 : i32
    %c0_i32_1 = arith.constant 0 : i32
    return %c0_i32, %c0_i32_0 : i32, i32
  }
  func.func @transform_5(%arg0: i32) -> (i32, i32) {
    %c0_i32 = arith.constant 0 : i32
    %c0_i32_0 = arith.constant 0 : i32
    %c0_i32_1 = arith.constant 0 : i32
    return %c0_i32, %c0_i32_0 : i32, i32
  }
}

</mosaic_0001>

<bundles_post_ra>
// kernel: tpu_custom_call.1
= control target key start
LH: loop header
LB: loop body
LE: loop exit
PB: predicated region body
PF: predicated region fallthrough
CT: control target
= control target key end

     0   :  { %10 = vsyncpa [#allocation4], 0  ;;  %s1734_s0 = inlined_call_operand.hbm [shape: f32[2,32,2048], index: 0, kind: input, shape index: {}]   ;;  %s1735_s1 = inlined_call_operand.vmem [shape: f32[32,2], index: 1, kind: input, shape index: {}]   ;;  %s1736_s2 = inlined_call_operand.vmem [shape: f32[1,2], index: 2, kind: input, shape index: {}]   ;;  %s1737_s3 = inlined_call_operand.vmem [shape: f32[2,32], index: 3, kind: input, shape index: {}]   ;;  %s1738_s4 = inlined_call_operand.vmem [shape: f32[1,32], index: 4, kind: input, shape index: {}]   ;;  %s1739_s5 = inlined_call_operand.hbm [shape: f32[2,32], index: 5, kind: output, shape index: {}]  }
   0x1   :  { %11 = vsyncpa [#allocation5], 0  ;;  %s1551_s18 = smov [#allocation3]  }
   0x2   :  { %s17_s19 = sshll.u32 %s1551_s18, 4  ;;  %s18_s19 = int_to_ptr.vmem [resolvable:$true] %s17_s19 }
   0x3   :  { %s1515_s20 = scalar_lea.vmem %s18_s19, 16384  ;;  %p1520_p1 = scmp.lt.s32.totalorder %s18_s19, %s18_s19 }
   0x4   :  { %p1516_p0 = scmp.ne.s32.totalorder %s18_s19, %s1515_s20  ;;  %p1521_p2 = scmp.lt.s32.totalorder %s1515_s20, %s1515_s20 }
   0x6   :  { %p1522_p3 = por %p1521_p2, %p1520_p1 }
   0x8   :  { %p1523_p4 = pnand %p1522_p3, %p1516_p0 }
   0xa   :  { %1526 = shalt.err (!%p1523_p4)
}
   0xb   :  { %s1552_s21 = smov 2048   ;;  %s1553_s22 = smov 128  }
   0xc   :  { %23 = dma.hbm_to_vmem [thread:$0]  %s1734_s0, 16384, %s18_s19, [#allocation4], %s1552_s21, %s1552_s21, %s1553_s22  }
   0xd   :  { %1547 = dma.done.wait [#allocation4], 16384  }
   0xe   :  { %1548 = vsyncadd [#allocation4], 4294950912  ;;  %v107_v0 = vld [vmem:[#allocation3 + $0x200] sm:$0xff]  ;;  %v108_v1 = vld [vmem:[#allocation3 + $0x208] sm:$0xff]  ;;  %vm39_vm0 = vcmask 254976   ;;  %vm1555_vm1 = vmmov 0  }
   0xf   :  { %v109_v2 = vld [vmem:[#allocation3 + $0x210] sm:$0xff]  ;;  %v239_v3 = vadd.f32 %v108_v1, %v107_v0  ;;  %v110_v4 = vld [vmem:[#allocation3 + $0x218] sm:$0xff]  ;;  %v111_v6 = vld [vmem:[#allocation3 + $0x220] sm:$0xff]  ;;  %vm326_vm2 = vcmask 130112   ;;  %vm333_vm3 = vcmask 195712   ;;  %vm340_vm4 = vcmask 261312  }
  0x10   :  { %v43_v8 = vld [vmem:[#allocation3] sm:$0xff]  ;;  %v44_v9 = vld [vmem:[#allocation3 + $0x8] sm:$0xff]  ;;  %v45_v11 = vld [vmem:[#allocation3 + $0x10] sm:$0xff]  ;;  %vm361_vm5 = vcmask 1041409   ;;  %vm383_vm6 = vcmask 261120   ;;  %vm885_vm7 = vcmask 1041408  }
  0x11   :  { %v240_v5 = vadd.f32 %v239_v3, %v109_v2  ;;  %v112_v10 = vld [vmem:[#allocation3 + $0x228] sm:$0xff]  ;;  %v171_v12 = vadd.f32 %v44_v9, %v43_v8  ;;  %v46_v14 = vld [vmem:[#allocation3 + $0x18] sm:$0xff]  ;;  %v113_v15 = vld [vmem:[#allocation3 + $0x230] sm:$0xff]  ;;  %vm881_vm8 = vcmask 15360  }
  0x12   :  { %v47_v18 = vld [vmem:[#allocation3 + $0x20] sm:$0xff]  ;;  %v114_v19 = vld [vmem:[#allocation3 + $0x238] sm:$0xff]  ;;  %v48_v23 = vld [vmem:[#allocation3 + $0x28] sm:$0xff] }
  0x13   :  { %v241_v7 = vadd.f32 %v240_v5, %v110_v4  ;;  %v172_v16 = vadd.f32 %v171_v12, %v45_v11  ;;  %v123_v21 = vld [vmem:[#allocation3 + $0x280] sm:$0xff]  ;;  %v124_v24 = vld [vmem:[#allocation3 + $0x288] sm:$0xff]  ;;  %v125_v25 = vld [vmem:[#allocation3 + $0x290] sm:$0xff] }
  0x14   :  { %v115_v26 = vld [vmem:[#allocation3 + $0x240] sm:$0xff]  ;;  %v256_v28 = vadd.f32 %v124_v24, %v123_v21  ;;  %v49_v30 = vld [vmem:[#allocation3 + $0x30] sm:$0xff]  ;;  %v126_v31 = vld [vmem:[#allocation3 + $0x298] sm:$0xff] }
  0x15   :  { %v242_v13 = vadd.f32 %v241_v7, %v111_v6  ;;  %v173_v20 = vadd.f32 %v172_v16, %v46_v14  ;;  %v116_v32 = vld [vmem:[#allocation3 + $0x248] sm:$0xff]  ;;  %v117_v35 = vld [vmem:[#allocation3 + $0x250] sm:$0xff]  ;;  %v50_v37 = vld [vmem:[#allocation3 + $0x38] sm:$0xff] }
  0x16   :  { %v257_v34 = vadd.f32 %v256_v28, %v125_v25  ;;  %v127_v38 = vld [vmem:[#allocation3 + $0x2a0] sm:$0xff]  ;;  %v60_v42 = vld [vmem:[#allocation3 + $0x88] sm:$0xff]  ;;  %v61_v43 = vld [vmem:[#allocation3 + $0x90] sm:$0xff] }
  0x17   :  { %v243_v17 = vadd.f32 %v242_v13, %v112_v10  ;;  %v174_v27 = vadd.f32 %v173_v20, %v47_v18  ;;  %v59_v41 = vld [vmem:[#allocation3 + $0x80] sm:$0xff]  ;;  %v128_v46 = vld [vmem:[#allocation3 + $0x2a8] sm:$0xff]  ;;  %v118_v48 = vld [vmem:[#allocation3 + $0x258] sm:$0xff] }
  0x18   :  { %v258_v40 = vadd.f32 %v257_v34, %v126_v31  ;;  %v51_v45 = vld [vmem:[#allocation3 + $0x40] sm:$0xff]  ;;  %v188_v47 = vadd.f32 %v60_v42, %v59_v41  ;;  %v62_v51 = vld [vmem:[#allocation3 + $0x98] sm:$0xff]  ;;  %v52_v54 = vld [vmem:[#allocation3 + $0x48] sm:$0xff] }
  0x19   :  { %v244_v22 = vadd.f32 %v243_v17, %v113_v15  ;;  %v175_v33 = vadd.f32 %v174_v27, %v48_v23  ;;  %v119_v52 = vld [vmem:[#allocation3 + $0x260] sm:$0xff]  ;;  %v129_v55 = vld [vmem:[#allocation3 + $0x2b0] sm:$0xff]  ;;  %v120_v57 = vld [vmem:[#allocation3 + $0x268] sm:$0xff] }
  0x1a   :  { %v259_v50 = vadd.f32 %v258_v40, %v127_v38  ;;  %v189_v56 = vadd.f32 %v188_v47, %v61_v43  ;;  %v53_v58 = vld [vmem:[#allocation3 + $0x50] sm:$0xff]  ;;  %v63_v61 = vld [vmem:[#allocation3 + $0xa0] sm:$0xff]  ;;  %v130_v63 = vld [vmem:[#allocation3 + $0x2b8] sm:$0xff] }
  0x1b   :  { %v245_v29 = vadd.f32 %v244_v22, %v114_v19  ;;  %v176_v39 = vadd.f32 %v175_v33, %v49_v30  ;;  %v139_v1 = vld [vmem:[#allocation3 + $0x300] sm:$0xff]  ;;  %v140_v2 = vld [vmem:[#allocation3 + $0x308] sm:$0xff]  ;;  %v121_v3 = vld [vmem:[#allocation3 + $0x270] sm:$0xff] }
  0x1c   :  { %v260_v60 = vadd.f32 %v259_v50, %v128_v46  ;;  %v190_v0 = vadd.f32 %v189_v56, %v62_v51  ;;  %v64_v6 = vld [vmem:[#allocation3 + $0xa8] sm:$0xff]  ;;  %v141_v7 = vld [vmem:[#allocation3 + $0x310] sm:$0xff]  ;;  %v273_v8 = vadd.f32 %v140_v2, %v139_v1  ;;  %v54_v10 = vld [vmem:[#allocation3 + $0x58] sm:$0xff] }
  0x1d   :  { %v246_v36 = vadd.f32 %v245_v29, %v115_v26  ;;  %v177_v49 = vadd.f32 %v176_v39, %v50_v37  ;;  %v131_v11 = vld [vmem:[#allocation3 + $0x2c0] sm:$0xff]  ;;  %v142_v13 = vld [vmem:[#allocation3 + $0x318] sm:$0xff]  ;;  %v65_v18 = vld [vmem:[#allocation3 + $0xb0] sm:$0xff] }
  0x1e   :  { %v261_v5 = vadd.f32 %v260_v60, %v129_v55  ;;  %v191_v12 = vadd.f32 %v190_v0, %v63_v61  ;;  %v122_v14 = vld [vmem:[#allocation3 + $0x278] sm:$0xff]  ;;  %v55_v15 = vld [vmem:[#allocation3 + $0x60] sm:$0xff]  ;;  %v274_v19 = vadd.f32 %v273_v8, %v141_v7  ;;  %v56_v21 = vld [vmem:[#allocation3 + $0x68] sm:$0xff] }
  0x1f   :  { %v247_v44 = vadd.f32 %v246_v36, %v116_v32  ;;  %v178_v59 = vadd.f32 %v177_v49, %v51_v45  ;;  %v132_v22 = vld [vmem:[#allocation3 + $0x2c8] sm:$0xff]  ;;  %v143_v24 = vld [vmem:[#allocation3 + $0x320] sm:$0xff]  ;;  %v133_v26 = vld [vmem:[#allocation3 + $0x2d0] sm:$0xff] }
  0x20   :  { %v262_v17 = vadd.f32 %v261_v5, %v130_v63  ;;  %v192_v23 = vadd.f32 %v191_v12, %v64_v6  ;;  %v66_v28 = vld [vmem:[#allocation3 + $0xb8] sm:$0xff]  ;;  %v275_v29 = vadd.f32 %v274_v19, %v142_v13  ;;  %v75_v30 = vld [vmem:[#allocation3 + $0x100] sm:$0xff]  ;;  %v144_v33 = vld [vmem:[#allocation3 + $0x328] sm:$0xff] }
  0x21   :  { %v248_v53 = vadd.f32 %v247_v44, %v117_v35  ;;  %v179_v4 = vadd.f32 %v178_v59, %v52_v54  ;;  %v76_v34 = vld [vmem:[#allocation3 + $0x108] sm:$0xff]  ;;  %v77_v35 = vld [vmem:[#allocation3 + $0x110] sm:$0xff]  ;;  %v67_v39 = vld [vmem:[#allocation3 + $0xc0] sm:$0xff] }
  0x22   :  { %v263_v27 = vadd.f32 %v262_v17, %v131_v11  ;;  %v193_v32 = vadd.f32 %v192_v23, %v65_v18  ;;  %v57_v36 = vld [vmem:[#allocation3 + $0x70] sm:$0xff]  ;;  %v276_v40 = vadd.f32 %v275_v29, %v143_v24  ;;  %v205_v41 = vadd.f32 %v76_v34, %v75_v30  ;;  %v134_v43 = vld [vmem:[#allocation3 + $0x2d8] sm:$0xff]  ;;  %v135_v49 = vld [vmem:[#allocation3 + $0x2e0] sm:$0xff] }
  0x23   :  { %v249_v62 = vadd.f32 %v248_v53, %v118_v48  ;;  %v180_v16 = vadd.f32 %v179_v4, %v53_v58  ;;  %v145_v45 = vld [vmem:[#allocation3 + $0x330] sm:$0xff]  ;;  %v78_v46 = vld [vmem:[#allocation3 + $0x118] sm:$0xff]  ;;  %v68_v51 = vld [vmem:[#allocation3 + $0xc8] sm:$0xff] }
  0x24   :  { %v264_v38 = vadd.f32 %v263_v27, %v132_v22  ;;  %v194_v44 = vadd.f32 %v193_v32, %v66_v28  ;;  %v58_v47 = vld [vmem:[#allocation3 + $0x78] sm:$0xff]  ;;  %v206_v53 = vadd.f32 %v205_v41, %v77_v35  ;;  %v69_v54 = vld [vmem:[#allocation3 + $0xd0] sm:$0xff]  ;;  %v156_v63 = vld [vmem:[#allocation3 + $0x388] sm:$0xff] }
  0x25   :  { %v250_v9 = vadd.f32 %v249_v62, %v119_v52  ;;  %v181_v25 = vadd.f32 %v180_v16, %v54_v10  ;;  %v277_v52 = vadd.f32 %v276_v40, %v144_v33  ;;  %v146_v56 = vld [vmem:[#allocation3 + $0x338] sm:$0xff]  ;;  %v155_v62 = vld [vmem:[#allocation3 + $0x380] sm:$0xff]  ;;  %v157_v0 = vld [vmem:[#allocation3 + $0x390] sm:$0xff] }
  0x26   :  { %v265_v50 = vadd.f32 %v264_v38, %v133_v26  ;;  %v195_v55 = vadd.f32 %v194_v44, %v67_v39  ;;  %v207_v61 = vadd.f32 %v206_v53, %v78_v46  ;;  %v136_v1 = vld [vmem:[#allocation3 + $0x2e8] sm:$0xff]  ;;  %v290_v5 = vadd.f32 %v156_v63, %v155_v62  ;;  %v137_v7 = vld [vmem:[#allocation3 + $0x2f0] sm:$0xff]  ;;  %v158_v12 = vld [vmem:[#allocation3 + $0x398] sm:$0xff] }
  0x27   :  { %v251_v20 = vadd.f32 %v250_v9, %v120_v57  ;;  %v182_v37 = vadd.f32 %v181_v25, %v55_v15  ;;  %v79_v57 = vld [vmem:[#allocation3 + $0x120] sm:$0xff]  ;;  %v278_v60 = vadd.f32 %v277_v52, %v145_v45  ;;  %v80_v4 = vld [vmem:[#allocation3 + $0x128] sm:$0xff]  ;;  %v70_v9 = vld [vmem:[#allocation3 + $0xd8] sm:$0xff] }
  0x28   :  { %v266_v59 = vadd.f32 %v265_v50, %v134_v43  ;;  %v196_v2 = vadd.f32 %v195_v55, %v68_v51  ;;  %v208_v11 = vadd.f32 %v207_v61, %v79_v57  ;;  %v138_v13 = vld [vmem:[#allocation3 + $0x2f8] sm:$0xff]  ;;  %v148_v15 = vld [vmem:[#allocation3 + $0x348] sm:$0xff]  ;;  %v81_v16 = vld [vmem:[#allocation3 + $0x130] sm:$0xff]  ;;  %v291_v17 = vadd.f32 %v290_v5, %v157_v0 }
  0x29   :  { %v252_v31 = vadd.f32 %v251_v20, %v121_v3  ;;  %v183_v48 = vadd.f32 %v182_v37, %v56_v21  ;;  %v147_v3 = vld [vmem:[#allocation3 + $0x340] sm:$0xff]  ;;  %v279_v10 = vadd.f32 %v278_v60, %v146_v56  ;;  %v149_v20 = vld [vmem:[#allocation3 + $0x350] sm:$0xff]  ;;  %v82_v25 = vld [vmem:[#allocation3 + $0x138] sm:$0xff] }
  0x2a   :  { %v267_v8 = vadd.f32 %v266_v59, %v135_v49  ;;  %v71_v19 = vld [vmem:[#allocation3 + $0xe0] sm:$0xff]  ;;  %v209_v22 = vadd.f32 %v208_v11, %v80_v4  ;;  %v292_v26 = vadd.f32 %v291_v17, %v158_v12  ;;  %v92_v28 = vld [vmem:[#allocation3 + $0x188] sm:$0xff]  ;;  %v93_v34 = vld [vmem:[#allocation3 + $0x190] sm:$0xff] }
  0x2b   :  { %v253_v42 = vadd.f32 %v252_v31, %v122_v14  ;;  %v184_v58 = vadd.f32 %v183_v48, %v57_v36  ;;  %v197_v14 = vadd.f32 %v196_v2, %v69_v54  ;;  %v280_v21 = vadd.f32 %v279_v10, %v147_v3  ;;  %v159_v23 = vld [vmem:[#allocation3 + $0x3a0] sm:$0xff]  ;;  %v72_v30 = vld [vmem:[#allocation3 + $0xe8] sm:$0xff]  ;;  %v150_v37 = vld [vmem:[#allocation3 + $0x358] sm:$0xff] }
  0x2c   :  { %v268_v18 = vadd.f32 %v267_v8, %v136_v1  ;;  %v91_v27 = vld [vmem:[#allocation3 + $0x180] sm:$0xff]  ;;  %v210_v32 = vadd.f32 %v209_v22, %v81_v16  ;;  %v160_v33 = vld [vmem:[#allocation3 + $0x3a8] sm:$0xff]  ;;  %v293_v39 = vadd.f32 %v292_v26, %v159_v23  ;;  %v94_v40 = vld [vmem:[#allocation3 + $0x198] sm:$0xff] }
  0x2d   :  { %254 = vadd.xlane.f32.xlu1 %v253_v42  ;;  %v185_v6 = vadd.f32 %v184_v58, %v58_v47  ;;  %v198_v24 = vadd.f32 %v197_v14, %v70_v9  ;;  %v281_v31 = vadd.f32 %v280_v21, %v148_v15  ;;  %v222_v35 = vadd.f32 %v92_v28, %v91_v27  ;;  %v83_v38 = vld [vmem:[#allocation3 + $0x140] sm:$0xff]  ;;  %v73_v42 = vld [vmem:[#allocation3 + $0xf0] sm:$0xff]  ;;  %v84_v49 = vld [vmem:[#allocation3 + $0x148] sm:$0xff] }
  0x2e   :  { %v269_v29 = vadd.f32 %v268_v18, %v137_v7  ;;  %v211_v44 = vadd.f32 %v210_v32, %v82_v25  ;;  %v161_v45 = vld [vmem:[#allocation3 + $0x3b0] sm:$0xff]  ;;  %v151_v48 = vld [vmem:[#allocation3 + $0x360] sm:$0xff]  ;;  %v294_v50 = vadd.f32 %v293_v39, %v160_v33  ;;  %v74_v52 = vld [vmem:[#allocation3 + $0xf8] sm:$0xff] }
  0x2f   :  { %186 = vadd.xlane.f32.xlu0 %v185_v6  ;;  %v199_v36 = vadd.f32 %v198_v24, %v71_v19  ;;  %v282_v43 = vadd.f32 %v281_v31, %v149_v20  ;;  %v223_v46 = vadd.f32 %v222_v35, %v93_v34  ;;  %v95_v51 = vld [vmem:[#allocation3 + $0x1a0] sm:$0xff]  ;;  %v162_v55 = vld [vmem:[#allocation3 + $0x3b8] sm:$0xff]  ;;  %v152_v58 = vld [vmem:[#allocation3 + $0x368] sm:$0xff] }
  0x30   :  { %v270_v41 = vadd.f32 %v269_v29, %v138_v13  ;;  %v212_v54 = vadd.f32 %v211_v44, %v83_v38  ;;  %v85_v59 = vld [vmem:[#allocation3 + $0x150] sm:$0xff]  ;;  %v295_v60 = vadd.f32 %v294_v50, %v161_v45  ;;  %v96_v61 = vld [vmem:[#allocation3 + $0x1a8] sm:$0xff]  ;;  %v163_v0 = vld [vmem:[#allocation3 + $0x3c0] sm:$0xff] }
  0x31   :  { %v200_v47 = vadd.f32 %v199_v36, %v72_v30  ;;  %v283_v53 = vadd.f32 %v282_v43, %v150_v37  ;;  %v224_v56 = vadd.f32 %v223_v46, %v94_v40  ;;  %v153_v3 = vld [vmem:[#allocation3 + $0x370] sm:$0xff]  ;;  %v86_v4 = vld [vmem:[#allocation3 + $0x158] sm:$0xff]  ;;  %v164_v9 = vld [vmem:[#allocation3 + $0x3c8] sm:$0xff] }
  0x32   :  { %271 = vadd.xlane.f32.xlu1 %v270_v41  ;;  %v213_v63 = vadd.f32 %v212_v54, %v84_v49  ;;  %v296_v5 = vadd.f32 %v295_v60, %v162_v55  ;;  %v97_v6 = vld [vmem:[#allocation3 + $0x1b0] sm:$0xff]  ;;  %v154_v11 = vld [vmem:[#allocation3 + $0x378] sm:$0xff]  ;;  %v87_v12 = vld [vmem:[#allocation3 + $0x160] sm:$0xff] }
  0x33   :  { %v201_v57 = vadd.f32 %v200_v47, %v73_v42  ;;  %v284_v62 = vadd.f32 %v283_v53, %v151_v48  ;;  %v225_v1 = vadd.f32 %v224_v56, %v95_v51  ;;  %v98_v14 = vld [vmem:[#allocation3 + $0x1b8] sm:$0xff]  ;;  %v165_v17 = vld [vmem:[#allocation3 + $0x3d0] sm:$0xff]  ;;  %v88_v19 = vld [vmem:[#allocation3 + $0x168] sm:$0xff]  ;;  %v1554_v56 = vmov 0.0  }
  0x34   :  { %v214_v8 = vadd.f32 %v213_v63, %v85_v59  ;;  %v297_v13 = vadd.f32 %v296_v5, %v163_v0  ;;  %v99_v21 = vld [vmem:[#allocation3 + $0x1c0] sm:$0xff]  ;;  %v166_v24 = vld [vmem:[#allocation3 + $0x3d8] sm:$0xff]  ;;  %v89_v26 = vld [vmem:[#allocation3 + $0x170] sm:$0xff]  ;;  %40 = vst.msk [vmem:[#allocation2] sm:$0x3] %vm39_vm0, %v1554_v56  ;;  %1412 = vmatprep.subr.mxu1 %v1554_v56  ;;  %1401 = vmatprep.subr.mxu0 %v1554_v56 }
  0x35   :  { %v202_v2 = vadd.f32 %v201_v57, %v74_v52  ;;  %v285_v7 = vadd.f32 %v284_v62, %v152_v58  ;;  %v226_v10 = vadd.f32 %v225_v1, %v96_v61  ;;  %v100_v28 = vld [vmem:[#allocation3 + $0x1c8] sm:$0xff]  ;;  %v167_v30 = vld [vmem:[#allocation3 + $0x3e0] sm:$0xff]  ;;  %v90_v32 = vld [vmem:[#allocation3 + $0x178] sm:$0xff]  ;;  %41 = vst.msk [vmem:[#allocation6] sm:$0x3] %vm39_vm0, %v1554_v56  ;;  %1420 = vmatprep.mubr.msk.f32.mxu1 %vm1555_vm1, %v1554_v56 }
  0x36   :  { %v215_v16 = vadd.f32 %v214_v8, %v86_v4  ;;  %v298_v20 = vadd.f32 %v297_v13, %v164_v9  ;;  %v101_v34 = vld [vmem:[#allocation3 + $0x1d0] sm:$0xff]  ;;  %v168_v36 = vld [vmem:[#allocation3 + $0x3e8] sm:$0xff]  ;;  %v102_v39 = vld [vmem:[#allocation3 + $0x1d8] sm:$0xff]  ;;  %1409 = vmatprep.mubr.msk.f32.mxu0 %vm1555_vm1, %v1554_v56 }
  0x37   :  { %203 = vadd.xlane.f32.xlu0 %v202_v2  ;;  %v286_v15 = vadd.f32 %v285_v7, %v153_v3  ;;  %v227_v18 = vadd.f32 %v226_v10, %v97_v6  ;;  %v169_v41 = vld [vmem:[#allocation3 + $0x3f0] sm:$0xff]  ;;  %v103_v44 = vld [vmem:[#allocation3 + $0x1e0] sm:$0xff]  ;;  %v170_v45 = vld [vmem:[#allocation3 + $0x3f8] sm:$0xff] }
  0x38   :  { %v216_v23 = vadd.f32 %v215_v16, %v87_v12  ;;  %v299_v27 = vadd.f32 %v298_v20, %v165_v17  ;;  %v104_v48 = vld [vmem:[#allocation3 + $0x1e8] sm:$0xff]  ;;  %v105_v51 = vld [vmem:[#allocation3 + $0x1f0] sm:$0xff]  ;;  %v106_v53 = vld [vmem:[#allocation3 + $0x1f8] sm:$0xff] }
  0x39   :  { %v287_v22 = vadd.f32 %v286_v15, %v154_v11  ;;  %v228_v25 = vadd.f32 %v227_v18, %v98_v14  ;;  %v375_v57 = vld [vmem:[%s1735_s1 + $0x18] sm:$0xff]  ;;  %v374_v59 = vld [vmem:[%s1735_s1 + $0x10] sm:$0xff]  ;;  %v373_v62 = vld [vmem:[%s1735_s1 + $0x8] sm:$0xff]  ;;  %v315_v18 = vlaneseq }
  0x3a   :  { %v217_v29 = vadd.f32 %v216_v23, %v88_v19  ;;  %v300_v33 = vadd.f32 %v299_v27, %v166_v24  ;;  %v1599_v58 = vand.u32 4294901760, %v375_v57  ;;  %v1607_v61 = vand.u32 4294901760, %v374_v59  ;;  %v372_v2 = vld [vmem:[%s1735_s1] sm:$0xff] }
  0x3b   :  { %288 = vadd.xlane.f32.xlu1 %v287_v22  ;;  %v229_v31 = vadd.f32 %v228_v25, %v99_v21  ;;  %v1618_v1 = vand.u32 4294901760, %v373_v62  ;;  %v1632_v6 = vand.u32 4294901760, %v372_v2  ;;  %v316_v21 = vand.u32 127, %v315_v18 }
  0x3c   :  { %v218_v35 = vadd.f32 %v217_v29, %v89_v26  ;;  %v301_v38 = vadd.f32 %v300_v33, %v167_v30  ;;  %v1605_v60 = vsub.f32 %v375_v57, %v1599_v58  ;;  %1402 = vmatpush3.msra.mxu0 %v1599_v58  ;;  %v1616_v0 = vsub.f32 %v374_v59, %v1607_v61 }
  0x3d   :  { %v230_v37 = vadd.f32 %v229_v31, %v100_v28  ;;  %1403 = vmatprep.subr.mxu0 %v1554_v56  ;;  %v1630_v5 = vsub.f32 %v373_v62, %v1618_v1  ;;  %v1645_v10 = vsub.f32 %v372_v2, %v1632_v6  ;;  %v321_v22 = vadd.s32 4294967288, %v316_v21 }
  0x3e   :  { %v219_v40 = vadd.f32 %v218_v35, %v90_v32  ;;  %v302_v43 = vadd.f32 %v301_v38, %v168_v36  ;;  %v493_v63 = vand.u32 4294901760, %v1605_v60  ;;  %1404 = vmatpush3.msra.mxu0 %v1607_v61  ;;  %v500_v4 = vand.u32 4294901760, %v1616_v0 }
  0x3f   :  { %v231_v42 = vadd.f32 %v230_v37, %v101_v34  ;;  %1405 = vmatprep.subr.mxu0 %v1554_v56  ;;  %v507_v9 = vand.u32 4294901760, %v1630_v5  ;;  %v514_v13 = vand.u32 4294901760, %v1645_v10  ;;  %v328_v24 = vadd.s32 4294967280, %v316_v21 }
  0x40   :  { %220 = vadd.xlane.f32.xlu0 %v219_v40  ;;  %v303_v47 = vadd.f32 %v302_v43, %v169_v41  ;;  %v494_v3 = vsub.f32 %v1605_v60, %v493_v63  ;;  %1406 = vmatpush3.msra.mxu0 %v1618_v1  ;;  %v501_v8 = vsub.f32 %v1616_v0, %v500_v4  ;;  %v318_v25 = vshrl.u32 %v315_v18, 7 }
  0x41   :  { %v232_v46 = vadd.f32 %v231_v42, %v102_v39  ;;  %1407 = vmatprep.subr.mxu0 %v1554_v56  ;;  %v508_v12 = vsub.f32 %v1630_v5, %v507_v9  ;;  %v515_v15 = vsub.f32 %v1645_v10, %v514_v13  ;;  %v335_v27 = vadd.s32 4294967272, %v316_v21 }
  0x42   :  { %v304_v50 = vadd.f32 %v303_v47, %v170_v45  ;;  %v495_v7 = vand.u32 4294901760, %v494_v3  ;;  %1408 = vmatpush3.msra.mxu0 %v1632_v6  ;;  %v502_v11 = vand.u32 4294901760, %v501_v8  ;;  %v324_v28 = vsub.s32 %v321_v22, %v318_v25 }
  0x43   :  { %v233_v49 = vadd.f32 %v232_v46, %v103_v44  ;;  %1423 = vmatprep.subr.mxu0 %v1554_v56  ;;  %v509_v14 = vand.u32 4294901760, %v508_v12  ;;  %v516_v16 = vand.u32 4294901760, %v515_v15  ;;  %v331_v29 = vsub.s32 %v328_v24, %v318_v25 }
  0x44   :  { %305 = vadd.xlane.f32.xlu1 %v304_v50  ;;  %1413 = vmatpush3.msra.mxu1 %v495_v7  ;;  %v319_v30 = vsub.s32 %v316_v21, %v318_v25  ;;  %v338_v31 = vsub.s32 %v335_v27, %v318_v25 }
  0x45   :  { %v234_v52 = vadd.f32 %v233_v49, %v104_v48  ;;  %1414 = vmatprep.subr.mxu1 %v1554_v56  ;;  %v42_v48 = vld [vmem:[#allocation2] sm:$0x3] }
  0x46   :  { %1415 = vmatpush3.msra.mxu1 %v502_v11 }
  0x47   :  { %v235_v54 = vadd.f32 %v234_v52, %v105_v51  ;;  %1416 = vmatprep.subr.mxu1 %v1554_v56 }
  0x48   :  { %1417 = vmatpush3.msra.mxu1 %v509_v14 }
  0x49   :  { %v236_v55 = vadd.f32 %v235_v54, %v106_v53  ;;  %1418 = vmatprep.subr.mxu1 %v1554_v56 }
  0x4a   :  { %1419 = vmatpush3.msra.mxu1 %v516_v16 }
  0x4b   :  { %237 = vadd.xlane.f32.xlu0 %v236_v55  ;;  %1434 = vmatprep.subr.mxu1 %v1554_v56 }
  0xb6   :  { %v255_v17 = vpop.xlane.xlu1 %254 }
  0xb7   :  { %v345_v36 = vrot.slane %v255_v17, %v319_v30 }
  0xb8   :  { %v187_v19 = vpop.xlane.xlu0 %186 }
  0xb9   :  { %v320_v40 = vrot.slane %v187_v19, %v319_v30 }
  0xbb   :  { %v272_v20 = vpop.xlane.xlu1 %271 }
  0xbc   :  { %v349_v33 = vrot.slane %v272_v20, %v324_v28 }
  0xbe   :  { %v350_v41 = vsel %vm326_vm2, %v349_v33, %v345_v36 }
  0xc0   :  { %v204_v23 = vpop.xlane.xlu0 %203 }
  0xc1   :  { %v325_v37 = vrot.slane %v204_v23, %v324_v28 }
  0xc3   :  { %v327_v44 = vsel %vm326_vm2, %v325_v37, %v320_v40 }
  0xc4   :  { %v289_v26 = vpop.xlane.xlu1 %288 }
  0xc5   :  { %v354_v35 = vrot.slane %v289_v26, %v331_v29 }
  0xc7   :  { %v355_v42 = vsel %vm333_vm3, %v354_v35, %v350_v41 }
  0xc9   :  { %v221_v32 = vpop.xlane.xlu0 %220 }
  0xca   :  { %v332_v39 = vrot.slane %v221_v32, %v331_v29 }
  0xcc   :  { %v334_v47 = vsel %vm333_vm3, %v332_v39, %v327_v44 }
  0xcd   :  { %v306_v34 = vpop.xlane.xlu1 %305 }
  0xce   :  { %v359_v38 = vrot.slane %v306_v34, %v338_v31  ;;  %v1358_v34 = vld [vmem:[%s1738_s4] ss:$0 sm:$0xff]  ;;  %s1556_s4 = smov [#allocation6]  }
  0xcf   :  { %s1348_s10 = sshll.u32 %s1556_s4, 4  ;;  %s1349_s10 = int_to_ptr.vmem [resolvable:$true] %s1348_s10 }
  0xd0   :  { %v360_v45 = vsel %vm340_vm4, %v359_v38, %v355_v42  ;;  %s1527_s11 = scalar_lea.vmem %s1349_s10, 32  ;;  %p1532_p6 = scmp.lt.s32.totalorder %s1349_s10, %s1349_s10 }
  0xd1   :  { %p1528_p5 = scmp.ne.s32.totalorder %s1349_s10, %s1527_s11  ;;  %p1533_p7 = scmp.lt.s32.totalorder %s1527_s11, %s1527_s11 }
  0xd3   :  { %p1534_p8 = por %p1533_p7, %p1532_p6 }
  0xd4   :  { %v238_v43 = vpop.xlane.xlu0 %237 }
  0xd5   :  { %v339_v46 = vrot.slane %v238_v43, %v338_v31  ;;  %p1535_p9 = pnand %p1534_p8, %p1528_p5 }
  0xd7   :  { %v341_v49 = vsel %vm340_vm4, %v339_v46, %v334_v47 }
  0xd8   :  { %v362_v50 = vsel %vm361_vm5, %v360_v45, %v341_v49 }
  0xd9   :  { %v364_v51 = vadd.f32 %v362_v50, %v42_v48 }
  0xdb   :  { %366 = vst.msk [vmem:[#allocation2] sm:$0x3] %vm39_vm0, %v364_v51 }
  0xe2   :  { %v370_v52 = vld [vmem:[#allocation2] sm:$0x3] }
  0xe3   :  { %v371_v53 = vmul.f32 0.00048828125, %v370_v52 }
  0xe5   :  { %v385_v54 = vsel %vm383_vm6, %v371_v53, 0 }
  0xe6   :  { %v456_v55 = vand.u32 4294901760, %v385_v54 }
  0xe8   :  { %v457_v57 = vsub.f32 %v385_v54, %v456_v55  ;;  %1421 = vmatmul.mubr.f32.vlgmr.msra.gmra.mxu1 %v456_v55 }
  0xe9   :  { %1435 = vmatpush3.msra.mxu1 %v1599_v58  ;;  %1442 = vmatprep.mubr.msk.f32.mxu1 %vm1555_vm1, %v1554_v56 }
  0xea   :  { %1436 = vmatprep.subr.mxu1 %v1554_v56  ;;  %v458_v59 = vand.u32 4294901760, %v457_v57 }
  0xeb   :  { %1437 = vmatpush3.msra.mxu1 %v1607_v61 }
  0xec   :  { %1438 = vmatprep.subr.mxu1 %v1554_v56  ;;  %v459_v62 = vsub.f32 %v457_v57, %v458_v59 }
  0xed   :  { %1439 = vmatpush3.msra.mxu1 %v1618_v1 }
  0xee   :  { %1440 = vmatprep.subr.mxu1 %v1554_v56  ;;  %v460_v2 = vand.u32 4294901760, %v459_v62 }
  0xef   :  { %1441 = vmatpush3.msra.mxu1 %v1632_v6 }
  0xf0   :  { %1443 = vmatmul.mubr.f32.vlgmr.msra.gmra.mxu1 %v458_v59  ;;  %1456 = vmatprep.subr.mxu1 %v1554_v56 }
  0xf1   :  { %1410 = vmatmul.mubr.f32.vlgmr.msra.gmra.mxu0 %v460_v2  ;;  %1457 = vmatpush3.msra.mxu1 %v1599_v58  ;;  %v873_v58 = vld [vmem:[%s1737_s3] sm:$0x3] }
  0xf2   :  { %1424 = vmatpush3.msra.mxu0 %v1605_v60  ;;  %1458 = vmatprep.subr.mxu1 %v1554_v56  ;;  %v887_v60 = vsel %vm885_vm7, %v873_v58, 0 }
  0xf3   :  { %1425 = vmatprep.subr.mxu0 %v1554_v56  ;;  %1459 = vmatpush3.msra.mxu1 %v1607_v61  ;;  %v920_v61 = vand.u32 4294901760, %v887_v60 }
  0xf4   :  { %1426 = vmatpush3.msra.mxu0 %v1616_v0  ;;  %1460 = vmatprep.subr.mxu1 %v1554_v56 }
  0xf5   :  { %1427 = vmatprep.subr.mxu0 %v1554_v56  ;;  %1461 = vmatpush3.msra.mxu1 %v1618_v1 }
  0xf6   :  { %1428 = vmatpush3.msra.mxu0 %v1630_v5  ;;  %1462 = vmatprep.subr.mxu1 %v1554_v56 }
  0xf7   :  { %1429 = vmatprep.subr.mxu0 %v1554_v56  ;;  %1431 = vmatprep.mubr.msk.f32.mxu0 %vm1555_vm1, %v1554_v56 }
  0xf8   :  { %1430 = vmatpush3.msra.mxu0 %v1645_v10  ;;  %1463 = vmatpush3.msra.mxu1 %v1632_v6  ;;  %v1357_v10 = vld [vmem:[%s1736_s2] ss:$0 sm:$0xff] }
  0xf9   :  { %1464 = vmatprep.mubr.msk.f32.mxu1 %vm1555_vm1, %v1554_v56  ;;  %1432 = vmatmul.mubr.f32.vlgmr.msra.gmra.mxu0 %v457_v57 }
  0xfa   :  { %1445 = vmatprep.subr.mxu0 %v1554_v56  ;;  %1465 = vmatmul.mubr.f32.vlgmr.msra.gmra.mxu1 %v456_v55 }
  0xfb   :  { %1446 = vmatpush3.msra.mxu0 %v493_v63  ;;  %1453 = vmatprep.mubr.msk.f32.mxu0 %vm1555_vm1, %v1554_v56  ;;  %v997_v63 = vsub.f32 %v887_v60, %v920_v61 }
  0xfc   :  { %1447 = vmatprep.subr.mxu0 %v1554_v56  ;;  %1472 = vmatprep.subr.mxu1 %v1554_v56 }
  0xfd   :  { %1448 = vmatpush3.msra.mxu0 %v500_v4  ;;  %1474 = vmatprep.mubr.msk.f32.mxu1 %vm1555_vm1, %v1554_v56  ;;  %v998_v0 = vand.u32 4294901760, %v997_v63 }
  0xfe   :  { %1449 = vmatprep.subr.mxu0 %v1554_v56 }
  0xff   :  { %1450 = vmatpush3.msra.mxu0 %v507_v9  ;;  %v999_v1 = vsub.f32 %v997_v63, %v998_v0 }
 0x100   :  { %1451 = vmatprep.subr.mxu0 %v1554_v56 }
 0x101   :  { %1452 = vmatpush3.msra.mxu0 %v514_v13  ;;  %v1000_v3 = vand.u32 4294901760, %v999_v1 }
 0x102   :  { %1454 = vmatmul.mubr.f32.vlgmr.msra.gmra.mxu0 %v456_v55  ;;  %1467 = vmatprep.subr.mxu0 %v1554_v56 }
 0x103   :  { %1469 = vmatprep.mubr.msk.f32.mxu0 %vm1555_vm1, %v1554_v56  ;;  %1468 = vmatpush3.msra.mxu0 %v920_v61 }
 0x104   :  { %1477 = vmatprep.subr.mxu0 %v1554_v56  ;;  %1473 = vmatpush3.msra.mxu1 %v1000_v3 }
 0x105   :  { %1482 = vmatprep.subr.mxu1 %v1554_v56 }
 0x1a8   :  { %v553_v4 = vpop.f32.mrf.mxu1 }
 0x1aa   :  { %v1422_v5 = vpop.f32.mrf.mxu1 }
 0x1b0   :  { %v710_v6 = vpop.f32.mrf.mxu1 }
 0x1b1   :  { %v462_v7 = vpop.f32.mrf.mxu0 }
 0x1b2   :  { %v1444_v8 = vpop.f32.mrf.mxu1  ;;  %v463_v11 = vadd.f32 %v1357_v10, %v462_v7 }
 0x1b3   :  { %v1411_v9 = vpop.f32.mrf.mxu0 }
 0x1b4   :  { %v554_v14 = vadd.f32 %v553_v4, %v463_v11 }
 0x1b9   :  { %v633_v12 = vpop.f32.mrf.mxu0 }
 0x1ba   :  { %v868_v13 = vpop.f32.mrf.mxu1  ;;  %v634_v17 = vadd.f32 %v633_v12, %v554_v14 }
 0x1bb   :  { %v1433_v15 = vpop.f32.mrf.mxu0 }
 0x1bc   :  { %v1466_v16 = vpop.f32.mrf.mxu1  ;;  %v711_v18 = vadd.f32 %v710_v6, %v634_v17 }
 0x1c2   :  { %v793_v19 = vpop.f32.mrf.mxu0 }
 0x1c3   :  { %v794_v20 = vadd.f32 %v793_v19, %v711_v18 }
 0x1c4   :  { %v1455_v21 = vpop.f32.mrf.mxu0 }
 0x1c5   :  { %v869_v22 = vadd.f32 %v868_v13, %v794_v20 }
 0x1c7   :  { %v872_v23 = vmax.f32 %v869_v22, 0.0 }
 0x1c9   :  { %v883_v24 = vsel %vm881_vm8, %v872_v23, 0 }
 0x1ca   :  { %v955_v25 = vand.u32 4294901760, %v883_v24 }
 0x1cc   :  { %v956_v26 = vsub.f32 %v883_v24, %v955_v25  ;;  %1475 = vmatmul.mubr.f32.vlgmr.msra.gmra.mxu1 %v955_v25 }
 0x1cd   :  { %1483 = vmatpush3.msra.mxu1 %v920_v61  ;;  %1484 = vmatprep.mubr.msk.f32.mxu1 %vm1555_vm1, %v1554_v56 }
 0x1ce   :  { %v957_v27 = vand.u32 4294901760, %v956_v26  ;;  %1492 = vmatprep.subr.mxu1 %v1554_v56 }
 0x1d0   :  { %1485 = vmatmul.mubr.f32.vlgmr.msra.gmra.mxu1 %v957_v27  ;;  %v958_v28 = vsub.f32 %v956_v26, %v957_v27 }
 0x1d1   :  { %1493 = vmatpush3.msra.mxu1 %v920_v61  ;;  %1494 = vmatprep.mubr.msk.f32.mxu1 %vm1555_vm1, %v1554_v56 }
 0x1d2   :  { %v959_v29 = vand.u32 4294901760, %v958_v28 }
 0x1d4   :  { %1470 = vmatmul.mubr.f32.vlgmr.msra.gmra.mxu0 %v959_v29  ;;  %1495 = vmatmul.mubr.f32.vlgmr.msra.gmra.mxu1 %v955_v25 }
 0x1d5   :  { %1478 = vmatpush3.msra.mxu0 %v997_v63  ;;  %1479 = vmatprep.mubr.msk.f32.mxu0 %vm1555_vm1, %v1554_v56 }
 0x1d6   :  { %1487 = vmatprep.subr.mxu0 %v1554_v56 }
 0x1d8   :  { %1480 = vmatmul.mubr.f32.vlgmr.msra.gmra.mxu0 %v956_v26 }
 0x1d9   :  { %1488 = vmatpush3.msra.mxu0 %v998_v0  ;;  %1489 = vmatprep.mubr.msk.f32.mxu0 %vm1555_vm1, %v1554_v56 }
 0x1dc   :  { %1490 = vmatmul.mubr.f32.vlgmr.msra.gmra.mxu0 %v955_v25 }
 0x28c   :  { %v1037_v30 = vpop.f32.mrf.mxu1 }
 0x28e   :  { %v1476_v31 = vpop.f32.mrf.mxu1 }
 0x290   :  { %v1185_v32 = vpop.f32.mrf.mxu1 }
 0x292   :  { %v1486_v33 = vpop.f32.mrf.mxu1 }
 0x294   :  { %v961_v35 = vpop.f32.mrf.mxu0  ;;  %v1331_v36 = vpop.f32.mrf.mxu1 }
 0x295   :  { %v962_v37 = vadd.f32 %v1358_v34, %v961_v35 }
 0x296   :  { %v1471_v38 = vpop.f32.mrf.mxu0  ;;  %v1496_v39 = vpop.f32.mrf.mxu1 }
 0x297   :  { %v1038_v40 = vadd.f32 %v1037_v30, %v962_v37 }
 0x298   :  { %v1111_v41 = vpop.f32.mrf.mxu0 }
 0x299   :  { %v1112_v42 = vadd.f32 %v1111_v41, %v1038_v40 }
 0x29a   :  { %v1481_v43 = vpop.f32.mrf.mxu0 }
 0x29b   :  { %v1186_v44 = vadd.f32 %v1185_v32, %v1112_v42 }
 0x29c   :  { %v1259_v56 = vpop.f32.mrf.mxu0 }
 0x29d   :  { %v1260_v45 = vadd.f32 %v1259_v56, %v1186_v44 }
 0x29e   :  { %v1491_v46 = vpop.f32.mrf.mxu0 }
 0x29f   :  { %v1332_v47 = vadd.f32 %v1331_v36, %v1260_v45 }
 0x2a1   :  { %v1335_v48 = vsub.f32 0.0, %v1332_v47 }
 0x2a3   :  { %v1336_v49 = vmul.f32 1.442695, %v1335_v48 }
 0x2a5   :  { %1503 = vpow2.f32 %v1336_v49 }
 0x2b2   :  { %v1504_v50 = vpop.eup %1503 }
 0x2b3   :  { %v1338_v51 = vadd.f32 1.0, %v1504_v50 }
 0x2b5   :  { %1505 = vrcp.f32 %v1338_v51 }
 0x2c2   :  { %v1506_v52 = vpop.eup %1505 }
 0x2c3   :  { %1341 = vst.msk [vmem:[#allocation6] sm:$0x3] %vm39_vm0, %v1506_v52 }
 0x2c4   :  { %1538 = shalt.err (!%p1535_p9)
}
 0x2c5   :  { %1351 = dma.vmem_to_hbm [thread:$0]  %s1349_s10, 32, %s1739_s5, [#allocation5]  }
 0x2c6   :  { %1549 = dma.done.wait [#allocation5], 32  }
 0x2c7   :  { %1550 = vsyncadd [#allocation5], 4294967264 }
 0x2c8   :  { %1355 = vsyncpa [#allocation4], 1 }
 0x2c9   :  { %1356 = vsyncpa [#allocation5], 1 }

</bundles_post_ra>
